<compile_context>
chip_gen: v7x
topology: tpu7x:2x2x1
jax: 0.10.0
libtpu: 0.0.40
codegen_flags: <defaults>
</compile_context>

<pallas_src>
import jax
import jax.numpy as jnp
from jax.experimental import pallas as pl
from jax.experimental.pallas import tpu as pltpu


def _upsample_kernel(rh_ref, rwt_ref, x2_ref, up_ref):
    # rh_ref : (TH, h)       one-hot row selection for this output tile
    # rwt_ref: (w, W)        one-hot column selection (transposed), resident
    # x2_ref : (1, C2, h, w) radar features, resident across H tiles
    # up_ref : (1, C2, TH, W)
    r_h = rh_ref[...]
    r_wt = rwt_ref[...]
    x2 = x2_ref[0].astype(r_h.dtype)          # (C2, h, w)

    # Row selection: t[c, T, w] = sum_h R_h[T, h] * x2[c, h, w]   -> (C2, TH, w)
    t = jnp.einsum('Th,chw->cTw', r_h, x2,
                   preferred_element_type=jnp.float32).astype(r_h.dtype)
    # Column selection, folding (C2, TH) into the matmul M dim   -> (C2, TH, W)
    up = jnp.einsum('cTw,wW->cTW', t, r_wt,
                    preferred_element_type=jnp.float32)
    up_ref[0] = up.astype(up_ref.dtype)


def _pick_tile_h(H, C2, h, w, W, out_itemsize, n_batch,
                 budget_bytes=20 * 1024 * 1024):
    """Largest H tile whose double-buffered working set fits the VMEM budget.

    Tile sizes are divisors of H that are multiples of 8 (sublane constraint),
    or H itself.  For single-batch calls we prefer >=2 tiles so both v7x
    TensorCores get work.
    """
    def step_bytes(th):
        out_tile = C2 * th * W * out_itemsize          # output tile
        rh_tile = th * h * 4                           # R_h tile
        resident = C2 * h * w * 4 + w * W * 4          # x2 + R_w^T
        inter = C2 * th * w * 4 + C2 * th * W * 4      # matmul intermediates
        return 2 * (out_tile + rh_tile + resident) + inter

    cands = sorted({H} | {t for t in range(8, H, 8) if H % t == 0},
                   reverse=True)
    fitting = [th for th in cands if step_bytes(th) <= budget_bytes]
    if not fitting:
        return cands[-1]
    if n_batch == 1 and len(fitting) > 1 and fitting[0] == H:
        return fitting[1]
    return fitting[0]


def concate_combiner(x1, x2):
    """Pallas implementation of ConcateCombiner.forward for 4-D (NCHW) inputs."""
    if 0 in x2.shape:
        return x1

    N, C1, H, W = x1.shape
    _, C2, h, w = x2.shape

    # One-hot nearest-neighbour selection matrices (PyTorch 'nearest' rule:
    # src = (dst * in) // out for non-negative integers), built once here.
    rdtype = jnp.bfloat16 if x2.dtype == jnp.bfloat16 else jnp.float32
    src_h = (jnp.arange(H, dtype=jnp.int32) * h) // H
    r_h = (src_h[:, None] == jnp.arange(h, dtype=jnp.int32)[None, :]
           ).astype(rdtype)                                           # (H, h)
    src_w = (jnp.arange(W, dtype=jnp.int32) * w) // W
    r_wt = (jnp.arange(w, dtype=jnp.int32)[:, None] == src_w[None, :]
            ).astype(rdtype)                                          # (w, W)

    TH = _pick_tile_h(H, C2, h, w, W, jnp.dtype(x2.dtype).itemsize, N)
    grid = (N, H // TH)

    up = pl.pallas_call(
        _upsample_kernel,
        out_shape=jax.ShapeDtypeStruct((N, C2, H, W), x2.dtype),
        grid=grid,
        in_specs=[
            pl.BlockSpec((TH, h), lambda n, t: (t, 0)),          # R_h tile
            pl.BlockSpec((w, W), lambda n, t: (0, 0)),           # R_w^T (resident)
            pl.BlockSpec((1, C2, h, w), lambda n, t: (n, 0, 0, 0)),  # x2 (per batch)
        ],
        out_specs=pl.BlockSpec((1, C2, TH, W), lambda n, t: (n, 0, t, 0)),
        compiler_params=pltpu.CompilerParams(
            dimension_semantics=("parallel", "parallel"),
            vmem_limit_bytes=48 * 1024 * 1024,
        ),
    )(r_h, r_wt, x2)

    # Channel concat outside the kernel: x1 is never routed through VMEM and
    # XLA can fuse this copy with whatever consumes y.
    y = jnp.concatenate([x1, up.astype(x1.dtype)], axis=1)
    return y, up


def _reference(x1, x2):
    """Pure-JAX reference (mirrors F.interpolate(mode='nearest') + cat)."""
    if 0 in x2.shape:
        return x1
    N, C1, H, W = x1.shape
    _, C2, h, w = x2.shape
    idx_h = (jnp.arange(H) * h) // H
    idx_w = (jnp.arange(W) * w) // W
    x2_ = x2[:, :, idx_h, :][:, :, :, idx_w]
    y = jnp.concatenate([x1, x2_.astype(x1.dtype)], axis=1)
    return y, x2_


if __name__ == "__main__":
    key = jax.random.PRNGKey(0)
    k1, k2, k3, k4 = jax.random.split(key, 4)

    # Case 1: 2x integer upsample, batch 2.
    x1 = jax.random.normal(k1, (2, 4, 16, 16), dtype=jnp.float32)
    x2 = jax.random.normal(k2, (2, 3, 8, 8), dtype=jnp.float32)
    y, x2_ = concate_combiner(x1, x2)
    jax.block_until_ready((y, x2_))
    y_ref, x2_ref = _reference(x1, x2)
    assert y.shape == (2, 7, 16, 16) and x2_.shape == (2, 3, 16, 16)
    assert jnp.allclose(y, y_ref, atol=1e-5), "y mismatch (case 1)"
    assert jnp.allclose(x2_, x2_ref, atol=1e-5), "x2_ mismatch (case 1)"

    # Case 2: non-integer scale, batch 1 (exercises the tiled-H path, grid=(1,3)).
    x1b = jax.random.normal(k3, (1, 4, 24, 16), dtype=jnp.float32)
    x2b = jax.random.normal(k4, (1, 3, 10, 12), dtype=jnp.float32)
    yb, x2b_ = concate_combiner(x1b, x2b)
    jax.block_until_ready((yb, x2b_))
    yb_ref, x2b_ref = _reference(x1b, x2b)
    assert yb.shape == (1, 7, 24, 16) and x2b_.shape == (1, 3, 24, 16)
    assert jnp.allclose(yb, yb_ref, atol=1e-5), "y mismatch (case 2)"
    assert jnp.allclose(x2b_, x2b_ref, atol=1e-5), "x2_ mismatch (case 2)"

    # Case 3: zero-sized radar path (handled statically, like the PyTorch module).
    x2_empty = jnp.zeros((2, 0, 8, 8), dtype=jnp.float32)
    out = concate_combiner(x1, x2_empty)
    jax.block_until_ready(out)
    assert out.shape == x1.shape

    print("KERNEL_OK")
</pallas_src>

<mosaic_0001>
module attributes {stable_mosaic.version = 11 : i64} {
  func.func @_upsample_kernel(%arg0: i32, %arg1: i32, %arg2: memref<16x8xf32, #tpu.memory_space<vmem>>, %arg3: memref<8x16xf32, #tpu.memory_space<vmem>>, %arg4: memref<1x3x8x8xf32, #tpu.memory_space<vmem>>, %arg5: memref<1x3x16x16xf32, #tpu.memory_space<vmem>>) attributes {dimension_semantics = [#tpu.dimension_semantics<parallel>, #tpu.dimension_semantics<parallel>], iteration_bounds = array<i64: 2, 1>, scalar_prefetch = 0 : i64, scratch_operands = 0 : i64, tpu.core_type = #tpu.core_type<tc>, window_params = [{transform_indices = @transform_0, window_bounds = array<i64: 16, 8>}, {pipeline_mode = #tpu.pipeline_mode<synchronous>, transform_indices = @transform_1, window_bounds = array<i64: 8, 16>}, {transform_indices = @transform_2, window_bounds = array<i64: 1, 3, 8, 8>}, {transform_indices = @transform_3, window_bounds = array<i64: 1, 3, 16, 16>}]} {
    %c0 = arith.constant 0 : index
    %c0_0 = arith.constant 0 : index
    %0 = vector.load %arg2[%c0, %c0_0] : memref<16x8xf32, #tpu.memory_space<vmem>>, vector<16x8xf32>
    %c0_1 = arith.constant 0 : index
    %c0_2 = arith.constant 0 : index
    %1 = vector.load %arg3[%c0_1, %c0_2] : memref<8x16xf32, #tpu.memory_space<vmem>>, vector<8x16xf32>
    %c0_3 = arith.constant 0 : index
    %c0_4 = arith.constant 0 : index
    %c0_5 = arith.constant 0 : index
    %c0_6 = arith.constant 0 : index
    %2 = vector.load %arg4[%c0_3, %c0_4, %c0_5, %c0_6] : memref<1x3x8x8xf32, #tpu.memory_space<vmem>>, vector<1x3x8x8xf32>
    %3 = vector.shape_cast %2 : vector<1x3x8x8xf32> to vector<3x8x8xf32>
    "tpu.trace_start"() <{level = 10 : i32, message = "Th,chw->cTw"}> : () -> ()
    %cst = arith.constant dense<0.000000e+00> : vector<3x8x16xf32>
    %4 = tpu.matmul %3, %0, %cst {dimension_numbers = #tpu.dot_dimension_numbers<[1], [1], [0, 2], [0], [0, 0, 0, 2, 1, 0], [], []>} : vector<3x8x8xf32>, vector<16x8xf32>, vector<3x8x16xf32> -> vector<3x8x16xf32>
    %5 = tpu.transpose %4, [0, 2, 1] : vector<3x8x16xf32> -> vector<3x16x8xf32>
    "tpu.trace_stop"() : () -> ()
    "tpu.trace_start"() <{level = 10 : i32, message = "cTw,wW->cTW"}> : () -> ()
    %cst_7 = arith.constant dense<0.000000e+00> : vector<3x16x16xf32>
    %6 = tpu.matmul %5, %1, %cst_7 {dimension_numbers = #tpu.dot_dimension_numbers<[2], [0], [0, 1], [1], [0, 0, 0, 1, 1, 1], [], []>} : vector<3x16x8xf32>, vector<8x16xf32>, vector<3x16x16xf32> -> vector<3x16x16xf32>
    "tpu.trace_stop"() : () -> ()
    %c0_8 = arith.constant 0 : index
    %c0_9 = arith.constant 0 : index
    %c0_10 = arith.constant 0 : index
    %c0_11 = arith.constant 0 : index
    %7 = vector.load %arg5[%c0_8, %c0_9, %c0_10, %c0_11] : memref<1x3x16x16xf32, #tpu.memory_space<vmem>>, vector<1x3x16x16xf32>
    %8 = vector.shape_cast %7 : vector<1x3x16x16xf32> to vector<3x16x16xf32>
    %9 = vector.shape_cast %6 : vector<3x16x16xf32> to vector<1x3x16x16xf32>
    tpu.vector_store %arg5[%c0_8, %c0_9, %c0_10, %c0_11], %9 {strides = array<i32>} : memref<1x3x16x16xf32, #tpu.memory_space<vmem>>, vector<1x3x16x16xf32>,
    return
  }
  func.func @transform_0(%arg0: i32, %arg1: i32) -> (i32, i32) {
    %c0_i32 = arith.constant 0 : i32
    %c0_i32_0 = arith.constant 0 : i32
    return %arg1, %c0_i32 : i32, i32
  }
  func.func @transform_1(%arg0: i32, %arg1: i32) -> (i32, i32) {
    %c0_i32 = arith.constant 0 : i32
    %c0_i32_0 = arith.constant 0 : i32
    %c0_i32_1 = arith.constant 0 : i32
    return %c0_i32, %c0_i32_0 : i32, i32
  }
  func.func @transform_2(%arg0: i32, %arg1: i32) -> (i32, i32, i32, i32) {
    %c0_i32 = arith.constant 0 : i32
    %c0_i32_0 = arith.constant 0 : i32
    %c0_i32_1 = arith.constant 0 : i32
    %c0_i32_2 = arith.constant 0 : i32
    return %arg0, %c0_i32, %c0_i32_0, %c0_i32_1 : i32, i32, i32, i32
  }
  func.func @transform_3(%arg0: i32, %arg1: i32) -> (i32, i32, i32, i32) {
    %c0_i32 = arith.constant 0 : i32
    %c0_i32_0 = arith.constant 0 : i32
    %c0_i32_1 = arith.constant 0 : i32
    return %arg0, %c0_i32, %arg1, %c0_i32_0 : i32, i32, i32, i32
  }
}

</mosaic_0001>

<bundles_post_ra>
// kernel: tpu_custom_call.1
= control target key start
LH: loop header
LB: loop body
LE: loop exit
PB: predicated region body
PF: predicated region fallthrough
CT: control target
= control target key end

     0   :  { %8 = vsyncpa [#allocation3], 0  ;;  %s1238_s0 = inlined_call_operand.vmem [shape: f32[16,8], index: 0, kind: input, shape index: {}]   ;;  %s1239_s1 = inlined_call_operand.vmem [shape: f32[8,16], index: 1, kind: input, shape index: {}]   ;;  %s1240_s2 = inlined_call_operand.hbm [shape: f32[2,3,8,8], index: 2, kind: input, shape index: {}]   ;;  %s1241_s3 = inlined_call_operand.hbm [shape: f32[2,3,16,16], index: 3, kind: output, shape index: {}]  }
   0x1   :  { %10 = vsyncpa [#allocation3 + $0x1], 0 }
   0x2   :  { %11 = vsyncpa [#allocation4], 0 }
   0x3   :  { %13 = vsyncpa [#allocation4 + $0x1], 0  ;;  %s1033_s12 = smov 0   ;;  %s1035_s13 = smov 0  }
   0x4   :  { %s1037_s14 = smov 0   ;;  %s1039_s15 = smov 0  }
   0x5   :  { %s1041_s16 = smov 0   ;;  %s1043_s17 = smov 0  }
   0x6 LB: > { %s755_s18 = sadd.s32 4294967295, %s1002_s17   ;;  %s756_s19 = sadd.s32 4294967294, %s1002_s17   ;;  %s1002_s17 = sphi %s1043_s17, %s19_s17   ;;  %s998_s16 = sphi %s1041_s16, %s1256_s16   ;;  %s994_s15 = sphi %s1039_s15, %s1255_s15   ;;  %s990_s14 = sphi %s1037_s14, %s1254_s14   ;;  %s986_s13 = sphi %s1035_s13, %s1253_s13   ;;  %s982_s12 = sphi %s1033_s12, %s1252_s12  }
   0x7   : > { %s31_s20 = sadd.s32 1, %s998_s16  ;;  %s85_s21 = sadd.s32 1, %s990_s14 }
   0x8   : > { %p33_p0 = scmp.ge.s32.totalorder %s31_s20, 2  ;;  %p92_p1 = scmp.ne.s32.totalorder %s990_s14, %s986_s13 }
   0x9   : > { %p93_p2 = scmp.eq.s32.totalorder %s1002_s17, 0  ;;  %p98_p3 = scmp.ne.s32.totalorder %s986_s13, %s982_s12 }
   0xa   : > { %s1258_s20 = smov (%p33_p0, %s31_s20), 0  ;;  %p99_p5 = scmp.eq.s32.totalorder %s755_s18, 0 }
   0xb   : > { %p1074_p4 = por %p93_p2, %p92_p1  ;;  %s82_s23 = ssub.s32 %s998_s16, %s1258_s20 }
   0xc   : > { %p124_p6 = scmp.eq.s32.totalorder %s755_s18, 1  ;;  %p83_p7 = scmp.eq.s32.totalorder %s82_s23, 0 }
   0xd   : > { %p1080_p8 = por %p99_p5, %p98_p3  ;;  %p130_p10 = scmp.eq.s32.totalorder %s756_s19, 1 }
   0xe   : > { %p1084_p9 = por %p124_p6, %p92_p1  ;;  %p833_p13 = scmp.lt.s32.totalorder %s1002_s17, 2 }
   0xf   : > { %s1089_s26 = scalar_select %p83_p7, %s990_s14, %s85_s21  }
  0x10   : > { %s1245_s25 = scalar_select %p1084_p9, 1, 0 }
  0x11   : > { %p1091_p11 = por %p130_p10, %p98_p3  ;;  %s162_s28 = sand.u32 1, %s990_s14  }
  0x12   : > { %s816_s29 = smul.u32 24, %s162_s28  ;;  %p1101_p0 = pnand %p833_p13, %p1074_p4 }
  0x13   : > { %s1246_s27 = scalar_select %p1091_p11, 1, 0 }
  0x14   : > { %s817_s30 = smul.u32 384, %s998_s16  ;;  %s166_s8 = scalar_lea.vmem [#allocation2], %s816_s29 }
  0x15   : > { %s173_s9 = sshll.u32 %s166_s8, 4  ;;  %s1113_s10 = scalar_lea.sflag [#allocation3], %s162_s28  ;;  %s1110_s9 = int_to_ptr.vmem [resolvable:$true] %s173_s9 }
  0x16   : > { %s1108_s7 = scalar_lea.hbm %s1240_s2, %s817_s30  ;;  %p892_p3 = pneg %p1101_p0 }
  0x17   : > { %s890_s11 = scalar_lea.hbm %s1108_s7, 384  ;;  %s895_s21 = scalar_lea.hbm %s1240_s2, 768 }
  0x18   : > { %p891_p2 = scmp.ne.s32.totalorder %s1108_s7, %s890_s11  ;;  %p896_p6 = scmp.lt.u32.totalorder %s1108_s7, %s1240_s2 }
  0x19   : > { %p897_p7 = scmp.lt.u32.totalorder %s895_s21, %s890_s11  ;;  %p899_p13 = scmp.lt.u32.totalorder %s890_s11, %s1108_s7 }
  0x1a   : > { %p893_p4 = pnand %p892_p3, %p891_p2 }
  0x1b   : > { %p898_p10 = por %p897_p7, %p896_p6 }
  0x1c   : > { %p894_p5 = pneg %p893_p4 }
  0x1d   : > { %p900_p12 = por %p899_p13, %p898_p10 }
  0x1f   : > { %p901_p1 = pnand %p900_p12, %p894_p5 }
  0x21   : > { %904 = shalt.err (!%p901_p1)
}
  0x22   : > { %s905_s28 = scalar_lea.vmem %s1110_s9, 384  ;;  %s1004_s29 = smov [#allocation2]  }
  0x23   : > { %p906_p2 = scmp.ne.s32.totalorder %s1110_s9, %s905_s28  ;;  %s910_s30 = sshll.u32 %s1004_s29, 4  ;;  %s911_s30 = int_to_ptr.vmem [resolvable:$false] %s910_s30 }
  0x24   : > { %s912_s5 = scalar_lea.vmem %s911_s30, 768  ;;  %p913_p9 = scmp.lt.s32.totalorder %s1110_s9, %s911_s30 }
  0x25   : > { %p908_p4 = pnand %p906_p2, %p892_p3  ;;  %p914_p6 = scmp.lt.s32.totalorder %s912_s5, %s905_s28 }
  0x27   : > { %p909_p11 = pneg %p908_p4  ;;  %p915_p7 = por %p914_p6, %p913_p9 }
  0x29   : > { %p916_p10 = pnand %p915_p7, %p909_p11 }
  0x2b   : > { %919 = shalt.err (!%p916_p10)
}
  0x2c   : > { %s1005_s6 = smov 128   ;;  %s1006_s8 = smov 8  }
  0x2d   : > { %828 = dma.hbm_to_vmem [thread:$0]  (!%p1101_p0), %s1108_s7, 384, %s1110_s9, %s1113_s10, %s1005_s6, %s1005_s6, %s1006_s8  }
  0x2e   : > { %p181_p12 = scmp.lt.s32.totalorder %s1002_s17, 3  ;;  %p1248_p1 = scmp.ge.s32.totalorder %s1002_s17, 1 }
  0x30   : > { %p182_p3 = pnand %p1248_p1, %p181_p12 }
  0x31   : > { %s1145_s11 = sand.u32 (!%p182_p3), 1, %s986_s13  }
  0x32   : > { %185 = sbr.rel (%p182_p3) target bundleno = 770 (0x302), region = 32  ;;  %s188_s19 = scalar_lea.sflag (!%p182_p3), [#allocation3], %s1145_s11 }
  0x33   : > { %s818_s18 = smul.u32 (!%p182_p3), 24, %s1145_s11 }
  0x35   : > { %s191_s21 = scalar_lea.vmem (!%p182_p3), [#allocation2], %s818_s18 }
  0x39   : > { %973 = dma.done.wait (%p1080_p8), %s188_s19, 384  }
  0x3a   : > { %975 = vsyncadd (%p1080_p8), %s188_s19, 4294966912  ;;  %v1007_v0 = vmov 0.0|0.0   ;;  %vm1008_vm0 = vmmov 0   ;;  %v1009_v1 = vmov 0.0   ;;  %vm328_vm1 = vcmask 64512   ;;  %v229_v2 = vld [vmem:[%s191_s21] sm:$0xff] }
  0x3b   : > { %812 = vmatprep.subr.bf16.mxu0 %v1007_v0  ;;  %792 = vmatprep.mubr.msk.f32.mxu0 %vm1008_vm0, %v1009_v1  ;;  %v231_v3 = vld [vmem:[%s191_s21 + $0x10] sm:$0xff]  ;;  %v227_v5 = vld [vmem:[%s1238_s0 + $0x8] sm:$0xff]  ;;  %vm814_vm2 = vmpackc.low %vm328_vm1, %vm328_vm1  ;;  %s819_s23 = smul.u32 48, %s1145_s11  ;;  %vm633_vm3 = vcmask 130048   ;;  %p1249_p9 = scmp.ne.s32.totalorder %s1245_s25, 0 }
  0x3c   : > { %232 = vxpose.xlu0.b32.start.end [1/1] (short) (narrow) %v229_v2, 8  ;;  %296 = vxpose.xlu1.b32.start.end [1/1] (short) (narrow) %v231_v3, 8  ;;  %v226_v4 = vld [vmem:[%s1238_s0] sm:$0xff]  ;;  %v230_v6 = vld [vmem:[%s191_s21 + $0x8] sm:$0xff]  ;;  %s820_s30 = smul.u32 768, %s994_s15  ;;  %s641_s15 = scalar_lea.sflag [#allocation4], %s1145_s11 }
  0x3d   : > { %v813_v7 = vpack.c.bf16 %v227_v5, %v226_v4  ;;  %v228_v13 = vld [vmem:[%s1239_s1] sm:$0xff]  ;;  %s218_s28 = scalar_lea.vmem [#allocation5], %s819_s23  ;;  %s1010_s19 = smov [#allocation5]  }
  0x3e   : > { %801 = vmatprep.subr.mxu1 %v228_v13  ;;  %s656_s29 = sshll.u32 %s218_s28, 4  ;;  %s1187_s8 = scalar_lea.hbm %s1241_s3, %s820_s30  ;;  %s1181_s29 = int_to_ptr.vmem [resolvable:$true] %s656_s29 }
  0x3f   : > { %815 = vmatpush3.bf16.xpose.msk.msra.mxu0 %vm814_vm2, %v813_v7  ;;  %802 = vmatpush3.msra.mxu1 %v228_v13  ;;  %s920_s18 = scalar_lea.vmem %s1181_s29, 768  ;;  %s924_s21 = sshll.u32 %s1010_s19, 4  ;;  %s925_s21 = int_to_ptr.vmem [resolvable:$false] %s924_s21 }
  0x40   : > { %264 = vxpose.xlu0.b32.start.end [1/1] (short) (narrow) %v230_v6, 8  ;;  %p921_p8 = scmp.ne.s32.totalorder %s1181_s29, %s920_s18  ;;  %s926_s4 = scalar_lea.vmem %s925_s21, 1536 }
  0x41   : > { %p927_p5 = scmp.lt.s32.totalorder %s1181_s29, %s925_s21  ;;  %p928_p13 = scmp.lt.s32.totalorder %s926_s4, %s920_s18 }
  0x42   : > { %p922_p11 = pnand %p921_p8, %p1249_p9 }
  0x43   : > { %p929_p2 = por %p928_p13, %p927_p5 }
  0x44   : > { %p923_p0 = pneg %p922_p11 }
  0x46   : > { %p930_p4 = pnand %p929_p2, %p923_p0 }
  0xbc   : > { %v248_v8 = vpop.trf.xlu0  ;;  %v312_v10 = vpop.trf.xlu1 }
  0xbd   : > { %793 = vmatmul.mubr.msk.f32.vlgmr.msra.gmra.mrb[0].mxu0 %vm328_vm1, %v248_v8 }
  0xbe   : > { %795 = vmatprep.mubr.msk.f32.mxu0 %vm1008_vm0, %v1009_v1 }
  0xc0   : > { %v280_v9 = vpop.trf.xlu0 }
  0xc1   : > { %796 = vmatmul.mubr.msk.f32.gmra.mrb[2].mxu0 %vm328_vm1, %v280_v9 }
  0xc2   : > { %798 = vmatprep.mubr.msk.f32.mxu0 %vm1008_vm0, %v1009_v1 }
  0xc5   : > { %799 = vmatmul.mubr.msk.f32.gmra.mrb[4].mxu0 %vm328_vm1, %v312_v10 }
 0x190   : > { %v410_v11 = vpop.f32.mrb[0].mxu0 }
 0x191   : > { %424 = vxpose.xlu1.b32.start.end [1/1] (short) (narrow) %v410_v11, 16  ;;  %v794_v12 = vpop.f32.mrb[1].mxu0 }
 0x194   : > { %v415_v14 = vpop.f32.mrb[2].mxu0 }
 0x195   : > { %456 = vxpose.xlu0.b32.start.end [1/1] (short) (narrow) %v415_v14, 16  ;;  %v797_v15 = vpop.f32.mrb[3].mxu0 }
 0x198   : > { %v420_v16 = vpop.f32.mrb[4].mxu0 }
 0x199   : > { %488 = vxpose.xlu1.b32.start.end [1/1] (short) (narrow) %v420_v16, 16  ;;  %v800_v17 = vpop.f32.mrb[5].mxu0 }
 0x211   : > { %v440_v18 = vpop.trf.xlu1 }
 0x212   : > { %803 = vmatprep.mubr.msk.f32.mxu1 %vm328_vm1, %v440_v18 }
 0x215   : > { %v441_v19 = vpop.trf.xlu1  ;;  %v472_v20 = vpop.trf.xlu0 }
 0x216   : > { %804 = vmatmul.mubr.msk.f32.vlgmr.msra.gmra.mrb[0].mxu1 %vm328_vm1, %v441_v19 }
 0x217   : > { %806 = vmatprep.mubr.msk.f32.mxu1 %vm328_vm1, %v472_v20 }
 0x219   : > { %v473_v21 = vpop.trf.xlu0  ;;  %v504_v22 = vpop.trf.xlu1 }
 0x21a   : > { %807 = vmatmul.mubr.msk.f32.gmra.mrb[2].mxu1 %vm328_vm1, %v473_v21 }
 0x21b   : > { %809 = vmatprep.mubr.msk.f32.mxu1 %vm328_vm1, %v504_v22 }
 0x21d   : > { %v505_v23 = vpop.trf.xlu1 }
 0x21e   : > { %810 = vmatmul.mubr.msk.f32.gmra.mrb[4].mxu1 %vm328_vm1, %v505_v23 }
 0x2e9   : > { %v805_v24 = vpop.f32.mrb[0].mxu1 }
 0x2ea   : > { %635 = vst.msk [vmem:[%s218_s28 + $0x8] sm:$0xff] %vm633_vm3, %v805_v24  ;;  %v604_v25 = vpop.f32.mrb[1].mxu1 }
 0x2eb   : > { %634 = vst.msk [vmem:[%s218_s28] sm:$0xff] %vm633_vm3, %v604_v25 }
 0x2ed   : > { %v808_v26 = vpop.f32.mrb[2].mxu1 }
 0x2ee   : > { %637 = vst.msk [vmem:[%s218_s28 + $0x18] sm:$0xff] %vm633_vm3, %v808_v26  ;;  %v614_v27 = vpop.f32.mrb[3].mxu1 }
 0x2ef   : > { %636 = vst.msk [vmem:[%s218_s28 + $0x10] sm:$0xff] %vm633_vm3, %v614_v27 }
 0x2f1   : > { %v811_v28 = vpop.f32.mrb[4].mxu1 }
 0x2f2   : > { %639 = vst.msk [vmem:[%s218_s28 + $0x28] sm:$0xff] %vm633_vm3, %v811_v28  ;;  %v624_v29 = vpop.f32.mrb[5].mxu1 }
 0x2f3   : > { %638 = vst.msk [vmem:[%s218_s28 + $0x20] sm:$0xff] %vm633_vm3, %v624_v29 }
 0x2f4   : > { %933 = shalt.err (!%p930_p4)
}
 0x2f5   : > { %s934_s7 = scalar_lea.hbm %s1187_s8, 768  ;;  %s938_s24 = scalar_lea.hbm %s1241_s3, 1536 }
 0x2f6   : > { %p935_p6 = scmp.ne.s32.totalorder %s1187_s8, %s934_s7  ;;  %p939_p12 = scmp.lt.u32.totalorder %s1187_s8, %s1241_s3 }
 0x2f7   : > { %p940_p1 = scmp.lt.u32.totalorder %s938_s24, %s934_s7  ;;  %p942_p8 = scmp.lt.u32.totalorder %s934_s7, %s1187_s8 }
 0x2f8   : > { %p936_p7 = pnand %p935_p6, %p1249_p9 }
 0x2f9   : > { %p941_p3 = por %p940_p1, %p939_p12 }
 0x2fa   : > { %p937_p10 = pneg %p936_p7 }
 0x2fb   : > { %p943_p11 = por %p942_p8, %p941_p3 }
 0x2fd   : > { %p944_p0 = pnand %p943_p11, %p937_p10 }
 0x2ff   : > { %947 = shalt.err (!%p944_p0)
}
 0x300   : > { %s1011_s28 = smov 128   ;;  %s1012_s30 = smov 8  }
 0x301   : > { %823 = dma.vmem_to_hbm [thread:$0]  (%p1249_p9), %s1181_s29, 768, %s1187_s8, %s641_s15, %s1011_s28, %s1011_s28, %s1012_s30  }
 0x302 PF: > { %s671_s5 = sand.u32 1, %s982_s12   ;;  %p1250_p5 = scmp.ne.s32.totalorder %s1246_s27, 0 }
 0x303   : > { %p1251_p13 = scmp.ge.s32.totalorder %s1002_s17, 2  ;;  %s672_s6 = scalar_lea.sflag [#allocation4], %s671_s5 }
 0x305   : > { %p830_p2 = pnand %p1251_p13, %p1250_p5 }
 0x307   : > { %977 = dma.done.wait (!%p830_p2), %s672_s6, 768  }
 0x308   : > { %979 = vsyncadd (!%p830_p2), %s672_s6, 4294966528  ;;  %s19_s17 = sadd.s32 1, %s1002_s17   ;;  %s1252_s12 = smov %s986_s13 }
 0x309   : > { %p16_p4 = scmp.ge.s32.totalorder %s19_s17, 4   ;;  %s1253_s13 = smov %s990_s14 }
 0x30a   : > { %s1254_s14 = smov %s1089_s26  ;;  %s1255_s15 = smov %s998_s16 }
 0x30b   : > { %s1256_s16 = smov %s1258_s20  ;;  %18 = sbr.rel (!%p16_p4) target bundleno = 6 (0x6), region = 80 }
 0x312   :  { %677 = vsyncpa [#allocation3], 1 }
 0x313   :  { %679 = vsyncpa [#allocation3 + $0x1], 1 }
 0x314   :  { %680 = vsyncpa [#allocation4], 1 }
 0x315   :  { %682 = vsyncpa [#allocation4 + $0x1], 1 }

</bundles_post_ra>
